<compile_context>
chip_gen: v7x
topology: tpu7x:2x2x1
jax: 0.10.0
libtpu: 0.0.40
codegen_flags: <defaults>
</compile_context>

<pallas_src>
import functools

import numpy as np
import jax
import jax.numpy as jnp
from jax import lax
from jax.experimental import pallas as pl
from jax.experimental.pallas import tpu as pltpu

# MXU operand dtype for the DFT and conv matmuls.  Accumulation stays f32 via
# preferred_element_type, so the module's 1e-2 reference tolerance holds.
_MXU_DTYPE = jnp.bfloat16

_LANE = 128            # TPU vreg lane width
_IM_HALF = 64          # Re/Im group width when M <= 64 (packed 128-lane axis)
_UNROLL_CIN_MAX = 32   # fully unroll the C_in accumulation loop up to this
_TB_MAX = 32           # cap on batch rows per grid step (bounds unrolled code)
_ROWS_MAX = 512        # cap on TB*C_in rows fed to the rfft matmul


def _round_up(x, m):
    return (x + m - 1) // m * m


@functools.lru_cache(maxsize=None)
def _dft_bases(n, m, g):
    """Packed truncated rfft/irfft bases.

    Spectral axis is L = 2*g lanes: lanes [0, m) carry Re, lanes [g, g+m)
    carry Im, the rest is zero padding.

      cf (n, L):  v @ cf = [Re F | Im F]
      ic (L, n):  [Re P | Im P] @ ic = irfft(P truncated to m modes)
                  row g (Im of DC, ignored by a real irfft) is all ones and
                  carries the folded conv bias.
    """
    l = 2 * g
    t = np.arange(n)[:, None]
    k = np.arange(m)[None, :]
    ang = 2.0 * np.pi * t * k / n                       # (n, m)

    cf = np.zeros((n, l), np.float32)
    cf[:, :m] = np.cos(ang)
    cf[:, g:g + m] = -np.sin(ang)

    # irfft of a half-spectrum whose only nonzero bins are the first m:
    #   x[t] = (1/n)[Re P[0] + sum_{k>=1} c_k (Re P[k] cos - Im P[k] sin)]
    # (imag parts of DC / Nyquist are ignored by irfft)
    c = np.full((m,), 2.0, np.float32)
    c[0] = 1.0
    if m - 1 == n // 2:
        c[-1] = 1.0
    ic = np.zeros((l, n), np.float32)
    ic[:m, :] = (c[:, None] * np.cos(ang.T)) / n
    ic[g:g + m, :] = -(c[:, None] * np.sin(ang.T)) / n
    ic[g, :] = 1.0          # bias row (Im-of-DC slot; real irfft ignores it)
    return cf, ic


def _vmem_capacity_bytes():
    try:
        cap = int(pltpu.get_tpu_info().vmem_capacity_bytes)
        if cap > 0:
            return cap
    except Exception:
        pass
    return 64 * 1024 * 1024          # conservative default (v7x per-TC VMEM)


def _vmem_limit_bytes(cap):
    # ~96 MiB on 128-MiB chips (v5e/v6e), ~56 MiB on v7x's 64 MiB.
    if cap >= 128 * 1024 * 1024:
        return cap - 32 * 1024 * 1024
    return max(cap - 8 * 1024 * 1024, 32 * 1024 * 1024)


def _vmem_bytes(tb, c_in, c_out, n, l):
    """Conservative VMEM estimate for one grid step (constants double-counted
    in case single-buffering is unavailable)."""
    f32, b16 = 4, 2
    v_blk = tb * c_in * n * f32
    o_blk = tb * c_out * n * f32
    consts = (2 * c_in * c_out * l * f32          # packed mixing weights
              + c_out * c_in * b16                # conv weight
              + c_out * l * f32                   # bias slab
              + 2 * n * l * b16)                  # rfft / irfft bases
    interm = (tb * c_in * n * b16                 # bf16 copy of v
              + 2 * tb * c_in * l * f32           # fri + rolled copy
              + tb * c_out * l * f32              # mixing accumulator
              + 2 * tb * c_out * n * f32)         # irfft result + epilogue temps
    return 2 * (v_blk + o_blk) + 2 * consts + interm


def _choose_tb(b, c_in, c_out, n, l, budget):
    """Batch rows per grid step: fill the rfft matmul M-dim, fit VMEM, prefer
    an even number of grid steps (v7x megacore sharding + pipelining slack)."""
    best, best_key = 1, (False, False, 1)
    for tb in range(1, min(b, _TB_MAX) + 1):
        if b % tb:
            continue
        if tb * c_in > _ROWS_MAX:
            continue
        if _vmem_bytes(tb, c_in, c_out, n, l) > budget:
            continue
        steps = b // tb
        key = (steps >= 2 and steps % 2 == 0,     # even #steps first
               steps >= 2 or b == 1,              # then >= 2 steps
               tb)                                # then the largest tile
        if key > best_key:
            best, best_key = tb, key
    return best


def _const_spec(shape, index_map, buffered):
    if buffered:
        # grid-invariant operand: single-buffered (no second VMEM copy)
        return pl.BlockSpec(shape, index_map, pipeline_mode=pl.Buffered(1))
    return pl.BlockSpec(shape, index_map)


def _fourier_layer_kernel(v_ref, w1_ref, w2_ref, cw_ref, cbp_ref, cf_ref, ic_ref,
                          o_ref, *, tb, c_in, c_out, g, l):
    n = v_ref.shape[-1]

    v3 = v_ref[...]                                       # (tb, c_in, n) f32
    v2 = v3.reshape(tb * c_in, n).astype(_MXU_DTYPE)      # rows = (t, i)

    # --- packed truncated rfft: one lane-dense bf16 MXU matmul --------------
    fri = jnp.dot(v2, cf_ref[...],
                  preferred_element_type=jnp.float32)     # (tb*c_in, l) f32
    # lane-swapped copy [Im | Re] for the complex cross terms (XLU rotate;
    # shift = g is symmetric, so rotation direction is irrelevant)
    fsw = pltpu.roll(fri, g, axis=1)
    fri3 = fri.reshape(tb, c_in, l)
    fsw3 = fsw.reshape(tb, c_in, l)

    # --- per-mode complex channel mixing, accumulated over C_in -------------
    # Single (tb, c_out, l) f32 accumulator; lane g is initialized with the
    # conv bias (the irfft basis has an all-ones row there, and the packed
    # mixing weights are zeroed on that lane).
    pri = jnp.broadcast_to(cbp_ref[...][None, :, :], (tb, c_out, l))
    if c_in <= _UNROLL_CIN_MAX:
        # small channel count: static unroll, all slices static.  The
        # (tb, l) mid-axis slice costs <= 1/(4*c_out) of the mixing math; a
        # channel-major fri would need an HBM-side transpose of v that costs
        # more than it saves (the layer is HBM-bound).
        for i in range(c_in):
            fr = fri3[:, i, :][:, None, :]                # (tb, 1, l)
            fw = fsw3[:, i, :][:, None, :]
            pri = pri + fr * w1_ref[i][None, :, :] + fw * w2_ref[i][None, :, :]
    else:
        # large channel count: rolled loop, per-channel weight rows read from
        # VMEM inside the loop
        def body(i, acc):
            fr = lax.dynamic_index_in_dim(fri3, i, axis=1, keepdims=True)
            fw = lax.dynamic_index_in_dim(fsw3, i, axis=1, keepdims=True)
            return acc + fr * w1_ref[i][None, :, :] + fw * w2_ref[i][None, :, :]
        pri = lax.fori_loop(0, c_in, body, pri)

    # --- packed truncated irfft (+ folded bias): one bf16 MXU matmul --------
    k2 = jnp.dot(pri.reshape(tb * c_out, l).astype(_MXU_DTYPE), ic_ref[...],
                 preferred_element_type=jnp.float32)      # (tb*c_out, n)
    k3 = k2.reshape(tb, c_out, n)

    # --- pointwise Conv1d (kernel_size=1) + spectral part --------------------
    cw = cw_ref[...]                                      # (c_out, c_in) bf16
    for t in range(tb):                                   # tb is small & static
        vt = v2[t * c_in:(t + 1) * c_in, :]               # contiguous (c_in, n)
        lin = jnp.dot(cw, vt, preferred_element_type=jnp.float32)
        o_ref[t] = (lin + k3[t]).astype(o_ref.dtype)      # bias already in k3


@functools.lru_cache(maxsize=None)
def _build_fourier_layer(buffered):
    @jax.jit
    def run(v, w_real, w_imag, conv_w, conv_b):
        B, C_in, N = v.shape
        C_out = conv_w.shape[0]
        M = w_real.shape[-1]
        assert M <= N // 2 + 1

        # packed spectral axis: Re group + Im group of width G each
        G = _IM_HALF if M <= _IM_HALF else _round_up(M, _LANE)
        L = 2 * G

        cap = _vmem_capacity_bytes()
        vmem_limit = _vmem_limit_bytes(cap)
        TB = _choose_tb(B, C_in, C_out, N, L, vmem_limit)

        # bases (built once at trace time), pre-cast to the MXU dtype
        cf_np, ic_np = _dft_bases(N, M, G)
        cf = jnp.asarray(cf_np, dtype=_MXU_DTYPE)         # (N, L)
        ic = jnp.asarray(ic_np, dtype=_MXU_DTYPE)         # (L, N)

        # packed complex mixing weights (f32: used on the VPU, not the MXU)
        #   W1 = [Wre | Wre], W2 = [-Wim | Wim]; lane G zeroed (bias slot)
        wr = w_real.astype(jnp.float32)
        wi = w_imag.astype(jnp.float32)
        w1 = jnp.zeros((C_in, C_out, L), jnp.float32)
        w1 = w1.at[..., :M].set(wr).at[..., G:G + M].set(wr).at[..., G].set(0.0)
        w2 = jnp.zeros((C_in, C_out, L), jnp.float32)
        w2 = w2.at[..., :M].set(-wi).at[..., G:G + M].set(wi).at[..., G].set(0.0)

        cw = conv_w.astype(_MXU_DTYPE)                    # (C_out, C_in)
        # bias slab: lane G carries conv_b, everything else zero
        cbp = jnp.zeros((C_out, L), jnp.float32).at[:, G].set(
            conv_b.astype(jnp.float32))

        kernel = functools.partial(_fourier_layer_kernel,
                                   tb=TB, c_in=C_in, c_out=C_out, g=G, l=L)

        const2 = lambda gi: (0, 0)
        const3 = lambda gi: (0, 0, 0)
        return pl.pallas_call(
            kernel,
            out_shape=jax.ShapeDtypeStruct((B, C_out, N), jnp.float32),
            grid=(B // TB,),
            in_specs=[
                pl.BlockSpec((TB, C_in, N), lambda gi: (gi, 0, 0)),   # v
                _const_spec((C_in, C_out, L), const3, buffered),      # W1
                _const_spec((C_in, C_out, L), const3, buffered),      # W2
                _const_spec((C_out, C_in), const2, buffered),         # conv1x1 w
                _const_spec((C_out, L), const2, buffered),            # bias slab
                _const_spec((N, L), const2, buffered),                # rfft basis
                _const_spec((L, N), const2, buffered),                # irfft basis
            ],
            out_specs=pl.BlockSpec((TB, C_out, N), lambda gi: (gi, 0, 0)),
            compiler_params=pltpu.CompilerParams(
                dimension_semantics=("parallel",),
                vmem_limit_bytes=vmem_limit,
            ),
        )(v.astype(jnp.float32), w1, w2, cw, cbp, cf, ic)

    return run


def fourier_layer_1d(v, w_real, w_imag, conv_w, conv_b):
    """Pallas implementation of FourierLayer1d.forward.

    v       : (B, C_in, N)     float32
    w_real  : (C_in, C_out, M) float32   real part of complex spectral kernel
    w_imag  : (C_in, C_out, M) float32   imag part
    conv_w  : (C_out, C_in)    float32   Conv1d kernel_size=1 weight (squeezed)
    conv_b  : (C_out,)         float32
    """
    try:
        # preferred: single-buffered constant operands (VMEM headroom on v7x)
        return _build_fourier_layer(True)(v, w_real, w_imag, conv_w, conv_b)
    except Exception:
        # defensive fallback if this JAX build rejects pipeline_mode/Buffered
        return _build_fourier_layer(False)(v, w_real, w_imag, conv_w, conv_b)


def reference(v, w_real, w_imag, conv_w, conv_b):
    """Plain-JAX mirror of the PyTorch forward (for correctness checking)."""
    B, C_in, N = v.shape
    C_out, M = w_real.shape[1], w_real.shape[2]
    F = jnp.fft.rfft(v, axis=-1)
    W = w_real.astype(jnp.complex64) + 1j * w_imag.astype(jnp.complex64)
    Pm = jnp.einsum('ijk,jlk->ilk', F[:, :, :M], W)
    P = jnp.zeros((B, C_out, N // 2 + 1), jnp.complex64).at[:, :, :M].set(Pm)
    K = jnp.fft.irfft(P, n=N, axis=-1)
    L = jnp.einsum('oi,bin->bon', conv_w, v) + conv_b[None, :, None]
    return L + K


if __name__ == "__main__":
    B, C_in, C_out, N, MODES = 2, 4, 4, 16, 6

    key = jax.random.PRNGKey(0)
    k_v, k_wr, k_wi, k_cw, k_cb = jax.random.split(key, 5)

    v = jax.random.normal(k_v, (B, C_in, N), dtype=jnp.float32)

    # spectral kernel: 1/(C_in*C_out) * U[0,1) (real and imag parts)
    scale = 1.0 / (C_in * C_out)
    w_real = scale * jax.random.uniform(k_wr, (C_in, C_out, MODES), dtype=jnp.float32)
    w_imag = scale * jax.random.uniform(k_wi, (C_in, C_out, MODES), dtype=jnp.float32)

    # Conv1d(kernel_size=1) params, PyTorch-style uniform(-1/sqrt(C_in), 1/sqrt(C_in))
    bound = 1.0 / np.sqrt(C_in)
    conv_w = jax.random.uniform(k_cw, (C_out, C_in), minval=-bound, maxval=bound,
                                dtype=jnp.float32)
    conv_b = jax.random.uniform(k_cb, (C_out,), minval=-bound, maxval=bound,
                                dtype=jnp.float32)

    out = jax.block_until_ready(fourier_layer_1d(v, w_real, w_imag, conv_w, conv_b))
    ref = jax.block_until_ready(reference(v, w_real, w_imag, conv_w, conv_b))

    if not np.allclose(np.asarray(out), np.asarray(ref), rtol=1e-2, atol=1e-2):
        raise AssertionError(
            f"mismatch: max abs diff = {np.max(np.abs(np.asarray(out) - np.asarray(ref)))}")

    print("KERNEL_OK")
</pallas_src>

<mosaic_0001>
module attributes {stable_mosaic.version = 11 : i64} {
  func.func @_fourier_layer_kernel(%arg0: i32, %arg1: memref<1x4x16xf32, #tpu.memory_space<vmem>>, %arg2: memref<4x4x128xf32, #tpu.memory_space<vmem>>, %arg3: memref<4x4x128xf32, #tpu.memory_space<vmem>>, %arg4: memref<4x4xbf16, #tpu.memory_space<vmem>>, %arg5: memref<4x128xf32, #tpu.memory_space<vmem>>, %arg6: memref<16x128xbf16, #tpu.memory_space<vmem>>, %arg7: memref<128x16xbf16, #tpu.memory_space<vmem>>, %arg8: memref<1x4x16xf32, #tpu.memory_space<vmem>>) attributes {dimension_semantics = [#tpu.dimension_semantics<parallel>], iteration_bounds = array<i64: 2>, scalar_prefetch = 0 : i64, scratch_operands = 0 : i64, tpu.core_type = #tpu.core_type<tc>, window_params = [{transform_indices = @transform_0, window_bounds = array<i64: 1, 4, 16>}, {pipeline_mode = #tpu.pipeline_mode<synchronous>, transform_indices = @transform_1, window_bounds = array<i64: 4, 4, 128>}, {pipeline_mode = #tpu.pipeline_mode<synchronous>, transform_indices = @transform_2, window_bounds = array<i64: 4, 4, 128>}, {pipeline_mode = #tpu.pipeline_mode<synchronous>, transform_indices = @transform_3, window_bounds = array<i64: 4, 4>}, {pipeline_mode = #tpu.pipeline_mode<synchronous>, transform_indices = @transform_4, window_bounds = array<i64: 4, 128>}, {pipeline_mode = #tpu.pipeline_mode<synchronous>, transform_indices = @transform_5, window_bounds = array<i64: 16, 128>}, {pipeline_mode = #tpu.pipeline_mode<synchronous>, transform_indices = @transform_6, window_bounds = array<i64: 128, 16>}, {transform_indices = @transform_7, window_bounds = array<i64: 1, 4, 16>}]} {
    %c0 = arith.constant 0 : index
    %c0_0 = arith.constant 0 : index
    %c0_1 = arith.constant 0 : index
    %0 = vector.load %arg1[%c0, %c0_0, %c0_1] : memref<1x4x16xf32, #tpu.memory_space<vmem>>, vector<1x4x16xf32>
    %1 = vector.shape_cast %0 : vector<1x4x16xf32> to vector<4x16xf32>
    %2 = arith.truncf %1 : vector<4x16xf32> to vector<4x16xbf16>
    %c0_2 = arith.constant 0 : index
    %c0_3 = arith.constant 0 : index
    %3 = vector.load %arg6[%c0_2, %c0_3] : memref<16x128xbf16, #tpu.memory_space<vmem>>, vector<16x128xbf16>
    %cst = arith.constant dense<0.000000e+00> : vector<4x128xf32>
    %4 = tpu.matmul %2, %3, %cst {dimension_numbers = #tpu.dot_dimension_numbers<[1], [0], [0], [1], [0, 0, 1, 1], [], []>} : vector<4x16xbf16>, vector<16x128xbf16>, vector<4x128xf32> -> vector<4x128xf32>
    %c64_i32 = arith.constant 64 : i32
    %5 = tpu.dynamic_rotate %4 by %c64_i32 dim 1 : vector<4x128xf32>, i32 -> vector<4x128xf32>
    %6 = vector.shape_cast %4 : vector<4x128xf32> to vector<1x4x128xf32>
    %7 = vector.shape_cast %5 : vector<4x128xf32> to vector<1x4x128xf32>
    %c0_4 = arith.constant 0 : index
    %c0_5 = arith.constant 0 : index
    %8 = vector.load %arg5[%c0_4, %c0_5] : memref<4x128xf32, #tpu.memory_space<vmem>>, vector<4x128xf32>
    %9 = vector.shape_cast %8 : vector<4x128xf32> to vector<1x4x128xf32>
    %10 = vector.extract_strided_slice %6 {offsets = [0, 0, 0], sizes = [1, 1, 128], strides = [1, 1, 1]} : vector<1x4x128xf32> to vector<1x1x128xf32>
    %11 = vector.shape_cast %10 : vector<1x1x128xf32> to vector<1x128xf32>
    %12 = vector.shape_cast %11 : vector<1x128xf32> to vector<1x1x128xf32>
    %13 = vector.extract_strided_slice %7 {offsets = [0, 0, 0], sizes = [1, 1, 128], strides = [1, 1, 1]} : vector<1x4x128xf32> to vector<1x1x128xf32>
    %14 = vector.shape_cast %13 : vector<1x1x128xf32> to vector<1x128xf32>
    %15 = vector.shape_cast %14 : vector<1x128xf32> to vector<1x1x128xf32>
    %c0_6 = arith.constant 0 : index
    %c0_7 = arith.constant 0 : index
    %c0_8 = arith.constant 0 : index
    %16 = vector.load %arg2[%c0_6, %c0_7, %c0_8] : memref<4x4x128xf32, #tpu.memory_space<vmem>>, vector<1x4x128xf32>
    %17 = vector.shape_cast %16 : vector<1x4x128xf32> to vector<4x128xf32>
    %18 = vector.shape_cast %17 : vector<4x128xf32> to vector<1x4x128xf32>
    %19 = vector.broadcast %12 : vector<1x1x128xf32> to vector<1x4x128xf32>
    %20 = arith.mulf %19, %18 : vector<1x4x128xf32>
    %21 = arith.addf %9, %20 : vector<1x4x128xf32>
    %c0_9 = arith.constant 0 : index
    %c0_10 = arith.constant 0 : index
    %c0_11 = arith.constant 0 : index
    %22 = vector.load %arg3[%c0_9, %c0_10, %c0_11] : memref<4x4x128xf32, #tpu.memory_space<vmem>>, vector<1x4x128xf32>
    %23 = vector.shape_cast %22 : vector<1x4x128xf32> to vector<4x128xf32>
    %24 = vector.shape_cast %23 : vector<4x128xf32> to vector<1x4x128xf32>
    %25 = vector.broadcast %15 : vector<1x1x128xf32> to vector<1x4x128xf32>
    %26 = arith.mulf %25, %24 : vector<1x4x128xf32>
    %27 = arith.addf %21, %26 : vector<1x4x128xf32>
    %28 = vector.extract_strided_slice %6 {offsets = [0, 1, 0], sizes = [1, 1, 128], strides = [1, 1, 1]} : vector<1x4x128xf32> to vector<1x1x128xf32>
    %29 = vector.shape_cast %28 : vector<1x1x128xf32> to vector<1x128xf32>
    %30 = vector.shape_cast %29 : vector<1x128xf32> to vector<1x1x128xf32>
    %31 = vector.extract_strided_slice %7 {offsets = [0, 1, 0], sizes = [1, 1, 128], strides = [1, 1, 1]} : vector<1x4x128xf32> to vector<1x1x128xf32>
    %32 = vector.shape_cast %31 : vector<1x1x128xf32> to vector<1x128xf32>
    %33 = vector.shape_cast %32 : vector<1x128xf32> to vector<1x1x128xf32>
    %c1 = arith.constant 1 : index
    %c0_12 = arith.constant 0 : index
    %c0_13 = arith.constant 0 : index
    %34 = vector.load %arg2[%c1, %c0_12, %c0_13] : memref<4x4x128xf32, #tpu.memory_space<vmem>>, vector<1x4x128xf32>
    %35 = vector.shape_cast %34 : vector<1x4x128xf32> to vector<4x128xf32>
    %36 = vector.shape_cast %35 : vector<4x128xf32> to vector<1x4x128xf32>
    %37 = vector.broadcast %30 : vector<1x1x128xf32> to vector<1x4x128xf32>
    %38 = arith.mulf %37, %36 : vector<1x4x128xf32>
    %39 = arith.addf %27, %38 : vector<1x4x128xf32>
    %c1_14 = arith.constant 1 : index
    %c0_15 = arith.constant 0 : index
    %c0_16 = arith.constant 0 : index
    %40 = vector.load %arg3[%c1_14, %c0_15, %c0_16] : memref<4x4x128xf32, #tpu.memory_space<vmem>>, vector<1x4x128xf32>
    %41 = vector.shape_cast %40 : vector<1x4x128xf32> to vector<4x128xf32>
    %42 = vector.shape_cast %41 : vector<4x128xf32> to vector<1x4x128xf32>
    %43 = vector.broadcast %33 : vector<1x1x128xf32> to vector<1x4x128xf32>
    %44 = arith.mulf %43, %42 : vector<1x4x128xf32>
    %45 = arith.addf %39, %44 : vector<1x4x128xf32>
    %46 = vector.extract_strided_slice %6 {offsets = [0, 2, 0], sizes = [1, 1, 128], strides = [1, 1, 1]} : vector<1x4x128xf32> to vector<1x1x128xf32>
    %47 = vector.shape_cast %46 : vector<1x1x128xf32> to vector<1x128xf32>
    %48 = vector.shape_cast %47 : vector<1x128xf32> to vector<1x1x128xf32>
    %49 = vector.extract_strided_slice %7 {offsets = [0, 2, 0], sizes = [1, 1, 128], strides = [1, 1, 1]} : vector<1x4x128xf32> to vector<1x1x128xf32>
    %50 = vector.shape_cast %49 : vector<1x1x128xf32> to vector<1x128xf32>
    %51 = vector.shape_cast %50 : vector<1x128xf32> to vector<1x1x128xf32>
    %c2 = arith.constant 2 : index
    %c0_17 = arith.constant 0 : index
    %c0_18 = arith.constant 0 : index
    %52 = vector.load %arg2[%c2, %c0_17, %c0_18] : memref<4x4x128xf32, #tpu.memory_space<vmem>>, vector<1x4x128xf32>
    %53 = vector.shape_cast %52 : vector<1x4x128xf32> to vector<4x128xf32>
    %54 = vector.shape_cast %53 : vector<4x128xf32> to vector<1x4x128xf32>
    %55 = vector.broadcast %48 : vector<1x1x128xf32> to vector<1x4x128xf32>
    %56 = arith.mulf %55, %54 : vector<1x4x128xf32>
    %57 = arith.addf %45, %56 : vector<1x4x128xf32>
    %c2_19 = arith.constant 2 : index
    %c0_20 = arith.constant 0 : index
    %c0_21 = arith.constant 0 : index
    %58 = vector.load %arg3[%c2_19, %c0_20, %c0_21] : memref<4x4x128xf32, #tpu.memory_space<vmem>>, vector<1x4x128xf32>
    %59 = vector.shape_cast %58 : vector<1x4x128xf32> to vector<4x128xf32>
    %60 = vector.shape_cast %59 : vector<4x128xf32> to vector<1x4x128xf32>
    %61 = vector.broadcast %51 : vector<1x1x128xf32> to vector<1x4x128xf32>
    %62 = arith.mulf %61, %60 : vector<1x4x128xf32>
    %63 = arith.addf %57, %62 : vector<1x4x128xf32>
    %64 = vector.extract_strided_slice %6 {offsets = [0, 3, 0], sizes = [1, 1, 128], strides = [1, 1, 1]} : vector<1x4x128xf32> to vector<1x1x128xf32>
    %65 = vector.shape_cast %64 : vector<1x1x128xf32> to vector<1x128xf32>
    %66 = vector.shape_cast %65 : vector<1x128xf32> to vector<1x1x128xf32>
    %67 = vector.extract_strided_slice %7 {offsets = [0, 3, 0], sizes = [1, 1, 128], strides = [1, 1, 1]} : vector<1x4x128xf32> to vector<1x1x128xf32>
    %68 = vector.shape_cast %67 : vector<1x1x128xf32> to vector<1x128xf32>
    %69 = vector.shape_cast %68 : vector<1x128xf32> to vector<1x1x128xf32>
    %c3 = arith.constant 3 : index
    %c0_22 = arith.constant 0 : index
    %c0_23 = arith.constant 0 : index
    %70 = vector.load %arg2[%c3, %c0_22, %c0_23] : memref<4x4x128xf32, #tpu.memory_space<vmem>>, vector<1x4x128xf32>
    %71 = vector.shape_cast %70 : vector<1x4x128xf32> to vector<4x128xf32>
    %72 = vector.shape_cast %71 : vector<4x128xf32> to vector<1x4x128xf32>
    %73 = vector.broadcast %66 : vector<1x1x128xf32> to vector<1x4x128xf32>
    %74 = arith.mulf %73, %72 : vector<1x4x128xf32>
    %75 = arith.addf %63, %74 : vector<1x4x128xf32>
    %c3_24 = arith.constant 3 : index
    %c0_25 = arith.constant 0 : index
    %c0_26 = arith.constant 0 : index
    %76 = vector.load %arg3[%c3_24, %c0_25, %c0_26] : memref<4x4x128xf32, #tpu.memory_space<vmem>>, vector<1x4x128xf32>
    %77 = vector.shape_cast %76 : vector<1x4x128xf32> to vector<4x128xf32>
    %78 = vector.shape_cast %77 : vector<4x128xf32> to vector<1x4x128xf32>
    %79 = vector.broadcast %69 : vector<1x1x128xf32> to vector<1x4x128xf32>
    %80 = arith.mulf %79, %78 : vector<1x4x128xf32>
    %81 = arith.addf %75, %80 : vector<1x4x128xf32>
    %82 = vector.shape_cast %81 : vector<1x4x128xf32> to vector<4x128xf32>
    %83 = arith.truncf %82 : vector<4x128xf32> to vector<4x128xbf16>
    %c0_27 = arith.constant 0 : index
    %c0_28 = arith.constant 0 : index
    %84 = vector.load %arg7[%c0_27, %c0_28] : memref<128x16xbf16, #tpu.memory_space<vmem>>, vector<128x16xbf16>
    %cst_29 = arith.constant dense<0.000000e+00> : vector<4x16xf32>
    %85 = tpu.matmul %83, %84, %cst_29 {dimension_numbers = #tpu.dot_dimension_numbers<[1], [0], [0], [1], [0, 0, 1, 1], [], []>} : vector<4x128xbf16>, vector<128x16xbf16>, vector<4x16xf32> -> vector<4x16xf32>
    %86 = vector.shape_cast %85 : vector<4x16xf32> to vector<1x4x16xf32>
    %c0_30 = arith.constant 0 : index
    %c0_31 = arith.constant 0 : index
    %87 = vector.load %arg4[%c0_30, %c0_31] : memref<4x4xbf16, #tpu.memory_space<vmem>>, vector<4x4xbf16>
    %cst_32 = arith.constant dense<0.000000e+00> : vector<4x16xf32>
    %88 = tpu.matmul %87, %2, %cst_32 {dimension_numbers = #tpu.dot_dimension_numbers<[1], [0], [0], [1], [0, 0, 1, 1], [], []>} : vector<4x4xbf16>, vector<4x16xbf16>, vector<4x16xf32> -> vector<4x16xf32>
    %89 = vector.shape_cast %86 : vector<1x4x16xf32> to vector<4x16xf32>
    %90 = arith.addf %88, %89 : vector<4x16xf32>
    %c0_33 = arith.constant 0 : index
    %c0_34 = arith.constant 0 : index
    %c0_35 = arith.constant 0 : index
    %91 = vector.load %arg8[%c0_33, %c0_34, %c0_35] : memref<1x4x16xf32, #tpu.memory_space<vmem>>, vector<1x4x16xf32>
    %92 = vector.shape_cast %91 : vector<1x4x16xf32> to vector<4x16xf32>
    %93 = vector.shape_cast %90 : vector<4x16xf32> to vector<1x4x16xf32>
    tpu.vector_store %arg8[%c0_33, %c0_34, %c0_35], %93 {strides = array<i32>} : memref<1x4x16xf32, #tpu.memory_space<vmem>>, vector<1x4x16xf32>,
    return
  }
  func.func @transform_0(%arg0: i32) -> (i32, i32, i32) {
    %c0_i32 = arith.constant 0 : i32
    %c0_i32_0 = arith.constant 0 : i32
    %c0_i32_1 = arith.constant 0 : i32
    return %arg0, %c0_i32, %c0_i32_0 : i32, i32, i32
  }
  func.func @transform_1(%arg0: i32) -> (i32, i32, i32) {
    %c0_i32 = arith.constant 0 : i32
    %c0_i32_0 = arith.constant 0 : i32
    %c0_i32_1 = arith.constant 0 : i32
    %c0_i32_2 = arith.constant 0 : i32
    return %c0_i32, %c0_i32_0, %c0_i32_1 : i32, i32, i32
  }
  func.func @transform_2(%arg0: i32) -> (i32, i32, i32) {
    %c0_i32 = arith.constant 0 : i32
    %c0_i32_0 = arith.constant 0 : i32
    %c0_i32_1 = arith.constant 0 : i32
    %c0_i32_2 = arith.constant 0 : i32
    return %c0_i32, %c0_i32_0, %c0_i32_1 : i32, i32, i32
  }
  func.func @transform_3(%arg0: i32) -> (i32, i32) {
    %c0_i32 = arith.constant 0 : i32
    %c0_i32_0 = arith.constant 0 : i32
    %c0_i32_1 = arith.constant 0 : i32
    return %c0_i32, %c0_i32_0 : i32, i32
  }
  func.func @transform_4(%arg0: i32) -> (i32, i32) {
    %c0_i32 = arith.constant 0 : i32
    %c0_i32_0 = arith.constant 0 : i32
    %c0_i32_1 = arith.constant 0 : i32
    return %c0_i32, %c0_i32_0 : i32, i32
  }
  func.func @transform_5(%arg0: i32) -> (i32, i32) {
    %c0_i32 = arith.constant 0 : i32
    %c0_i32_0 = arith.constant 0 : i32
    %c0_i32_1 = arith.constant 0 : i32
    return %c0_i32, %c0_i32_0 : i32, i32
  }
  func.func @transform_6(%arg0: i32) -> (i32, i32) {
    %c0_i32 = arith.constant 0 : i32
    %c0_i32_0 = arith.constant 0 : i32
    %c0_i32_1 = arith.constant 0 : i32
    return %c0_i32, %c0_i32_0 : i32, i32
  }
  func.func @transform_7(%arg0: i32) -> (i32, i32, i32) {
    %c0_i32 = arith.constant 0 : i32
    %c0_i32_0 = arith.constant 0 : i32
    %c0_i32_1 = arith.constant 0 : i32
    return %arg0, %c0_i32, %c0_i32_0 : i32, i32, i32
  }
}

module attributes {stable_mosaic.version = 11 : i64} {
  func.func @_fourier_layer_kernel(%arg0: i32, %arg1: memref<1x4x16xf32, #tpu.memory_space<vmem>>, %arg2: memref<4x4x128xf32, #tpu.memory_space<vmem>>, %arg3: memref<4x4x128xf32, #tpu.memory_space<vmem>>, %arg4: memref<4x4xbf16, #tpu.memory_space<vmem>>, %arg5: memref<4x128xf32, #tpu.memory_space<vmem>>, %arg6: memref<16x128xbf16, #tpu.memory_space<vmem>>, %arg7: memref<128x16xbf16, #tpu.memory_space<vmem>>, %arg8: memref<1x4x16xf32, #tpu.memory_space<vmem>>) attributes {dimension_semantics = [#tpu.dimension_semantics<parallel>], iteration_bounds = array<i64: 2>, scalar_prefetch = 0 : i64, scratch_operands = 0 : i64, tpu.core_type = #tpu.core_type<tc>, window_params = [{transform_indices = @transform_0, window_bounds = array<i64: 1, 4, 16>}, {pipeline_mode = #tpu.pipeline_mode<synchronous>, transform_indices = @transform_1, window_bounds = array<i64: 4, 4, 128>}, {pipeline_mode = #tpu.pipeline_mode<synchronous>, transform_indices = @transform_2, window_bounds = array<i64: 4, 4, 128>}, {pipeline_mode = #tpu.pipeline_mode<synchronous>, transform_indices = @transform_3, window_bounds = array<i64: 4, 4>}, {pipeline_mode = #tpu.pipeline_mode<synchronous>, transform_indices = @transform_4, window_bounds = array<i64: 4, 128>}, {pipeline_mode = #tpu.pipeline_mode<synchronous>, transform_indices = @transform_5, window_bounds = array<i64: 16, 128>}, {pipeline_mode = #tpu.pipeline_mode<synchronous>, transform_indices = @transform_6, window_bounds = array<i64: 128, 16>}, {transform_indices = @transform_7, window_bounds = array<i64: 1, 4, 16>}]} {
    %c0 = arith.constant 0 : index
    %c0_0 = arith.constant 0 : index
    %c0_1 = arith.constant 0 : index
    %0 = vector.load %arg1[%c0, %c0_0, %c0_1] : memref<1x4x16xf32, #tpu.memory_space<vmem>>, vector<1x4x16xf32>
    %1 = vector.shape_cast %0 : vector<1x4x16xf32> to vector<4x16xf32>
    %2 = arith.truncf %1 : vector<4x16xf32> to vector<4x16xbf16>
    %c0_2 = arith.constant 0 : index
    %c0_3 = arith.constant 0 : index
    %3 = vector.load %arg6[%c0_2, %c0_3] : memref<16x128xbf16, #tpu.memory_space<vmem>>, vector<16x128xbf16>
    %cst = arith.constant dense<0.000000e+00> : vector<4x128xf32>
    %4 = tpu.matmul %2, %3, %cst {dimension_numbers = #tpu.dot_dimension_numbers<[1], [0], [0], [1], [0, 0, 1, 1], [], []>} : vector<4x16xbf16>, vector<16x128xbf16>, vector<4x128xf32> -> vector<4x128xf32>
    %c64_i32 = arith.constant 64 : i32
    %5 = tpu.dynamic_rotate %4 by %c64_i32 dim 1 : vector<4x128xf32>, i32 -> vector<4x128xf32>
    %6 = vector.shape_cast %4 : vector<4x128xf32> to vector<1x4x128xf32>
    %7 = vector.shape_cast %5 : vector<4x128xf32> to vector<1x4x128xf32>
    %c0_4 = arith.constant 0 : index
    %c0_5 = arith.constant 0 : index
    %8 = vector.load %arg5[%c0_4, %c0_5] : memref<4x128xf32, #tpu.memory_space<vmem>>, vector<4x128xf32>
    %9 = vector.shape_cast %8 : vector<4x128xf32> to vector<1x4x128xf32>
    %10 = vector.extract_strided_slice %6 {offsets = [0, 0, 0], sizes = [1, 1, 128], strides = [1, 1, 1]} : vector<1x4x128xf32> to vector<1x1x128xf32>
    %11 = vector.shape_cast %10 : vector<1x1x128xf32> to vector<1x128xf32>
    %12 = vector.shape_cast %11 : vector<1x128xf32> to vector<1x1x128xf32>
    %13 = vector.extract_strided_slice %7 {offsets = [0, 0, 0], sizes = [1, 1, 128], strides = [1, 1, 1]} : vector<1x4x128xf32> to vector<1x1x128xf32>
    %14 = vector.shape_cast %13 : vector<1x1x128xf32> to vector<1x128xf32>
    %15 = vector.shape_cast %14 : vector<1x128xf32> to vector<1x1x128xf32>
    %c0_6 = arith.constant 0 : index
    %c0_7 = arith.constant 0 : index
    %c0_8 = arith.constant 0 : index
    %16 = vector.load %arg2[%c0_6, %c0_7, %c0_8] : memref<4x4x128xf32, #tpu.memory_space<vmem>>, vector<1x4x128xf32>
    %17 = vector.shape_cast %16 : vector<1x4x128xf32> to vector<4x128xf32>
    %18 = vector.shape_cast %17 : vector<4x128xf32> to vector<1x4x128xf32>
    %19 = vector.broadcast %12 : vector<1x1x128xf32> to vector<1x4x128xf32>
    %20 = arith.mulf %19, %18 : vector<1x4x128xf32>
    %21 = arith.addf %9, %20 : vector<1x4x128xf32>
    %c0_9 = arith.constant 0 : index
    %c0_10 = arith.constant 0 : index
    %c0_11 = arith.constant 0 : index
    %22 = vector.load %arg3[%c0_9, %c0_10, %c0_11] : memref<4x4x128xf32, #tpu.memory_space<vmem>>, vector<1x4x128xf32>
    %23 = vector.shape_cast %22 : vector<1x4x128xf32> to vector<4x128xf32>
    %24 = vector.shape_cast %23 : vector<4x128xf32> to vector<1x4x128xf32>
    %25 = vector.broadcast %15 : vector<1x1x128xf32> to vector<1x4x128xf32>
    %26 = arith.mulf %25, %24 : vector<1x4x128xf32>
    %27 = arith.addf %21, %26 : vector<1x4x128xf32>
    %28 = vector.extract_strided_slice %6 {offsets = [0, 1, 0], sizes = [1, 1, 128], strides = [1, 1, 1]} : vector<1x4x128xf32> to vector<1x1x128xf32>
    %29 = vector.shape_cast %28 : vector<1x1x128xf32> to vector<1x128xf32>
    %30 = vector.shape_cast %29 : vector<1x128xf32> to vector<1x1x128xf32>
    %31 = vector.extract_strided_slice %7 {offsets = [0, 1, 0], sizes = [1, 1, 128], strides = [1, 1, 1]} : vector<1x4x128xf32> to vector<1x1x128xf32>
    %32 = vector.shape_cast %31 : vector<1x1x128xf32> to vector<1x128xf32>
    %33 = vector.shape_cast %32 : vector<1x128xf32> to vector<1x1x128xf32>
    %c1 = arith.constant 1 : index
    %c0_12 = arith.constant 0 : index
    %c0_13 = arith.constant 0 : index
    %34 = vector.load %arg2[%c1, %c0_12, %c0_13] : memref<4x4x128xf32, #tpu.memory_space<vmem>>, vector<1x4x128xf32>
    %35 = vector.shape_cast %34 : vector<1x4x128xf32> to vector<4x128xf32>
    %36 = vector.shape_cast %35 : vector<4x128xf32> to vector<1x4x128xf32>
    %37 = vector.broadcast %30 : vector<1x1x128xf32> to vector<1x4x128xf32>
    %38 = arith.mulf %37, %36 : vector<1x4x128xf32>
    %39 = arith.addf %27, %38 : vector<1x4x128xf32>
    %c1_14 = arith.constant 1 : index
    %c0_15 = arith.constant 0 : index
    %c0_16 = arith.constant 0 : index
    %40 = vector.load %arg3[%c1_14, %c0_15, %c0_16] : memref<4x4x128xf32, #tpu.memory_space<vmem>>, vector<1x4x128xf32>
    %41 = vector.shape_cast %40 : vector<1x4x128xf32> to vector<4x128xf32>
    %42 = vector.shape_cast %41 : vector<4x128xf32> to vector<1x4x128xf32>
    %43 = vector.broadcast %33 : vector<1x1x128xf32> to vector<1x4x128xf32>
    %44 = arith.mulf %43, %42 : vector<1x4x128xf32>
    %45 = arith.addf %39, %44 : vector<1x4x128xf32>
    %46 = vector.extract_strided_slice %6 {offsets = [0, 2, 0], sizes = [1, 1, 128], strides = [1, 1, 1]} : vector<1x4x128xf32> to vector<1x1x128xf32>
    %47 = vector.shape_cast %46 : vector<1x1x128xf32> to vector<1x128xf32>
    %48 = vector.shape_cast %47 : vector<1x128xf32> to vector<1x1x128xf32>
    %49 = vector.extract_strided_slice %7 {offsets = [0, 2, 0], sizes = [1, 1, 128], strides = [1, 1, 1]} : vector<1x4x128xf32> to vector<1x1x128xf32>
    %50 = vector.shape_cast %49 : vector<1x1x128xf32> to vector<1x128xf32>
    %51 = vector.shape_cast %50 : vector<1x128xf32> to vector<1x1x128xf32>
    %c2 = arith.constant 2 : index
    %c0_17 = arith.constant 0 : index
    %c0_18 = arith.constant 0 : index
    %52 = vector.load %arg2[%c2, %c0_17, %c0_18] : memref<4x4x128xf32, #tpu.memory_space<vmem>>, vector<1x4x128xf32>
    %53 = vector.shape_cast %52 : vector<1x4x128xf32> to vector<4x128xf32>
    %54 = vector.shape_cast %53 : vector<4x128xf32> to vector<1x4x128xf32>
    %55 = vector.broadcast %48 : vector<1x1x128xf32> to vector<1x4x128xf32>
    %56 = arith.mulf %55, %54 : vector<1x4x128xf32>
    %57 = arith.addf %45, %56 : vector<1x4x128xf32>
    %c2_19 = arith.constant 2 : index
    %c0_20 = arith.constant 0 : index
    %c0_21 = arith.constant 0 : index
    %58 = vector.load %arg3[%c2_19, %c0_20, %c0_21] : memref<4x4x128xf32, #tpu.memory_space<vmem>>, vector<1x4x128xf32>
    %59 = vector.shape_cast %58 : vector<1x4x128xf32> to vector<4x128xf32>
    %60 = vector.shape_cast %59 : vector<4x128xf32> to vector<1x4x128xf32>
    %61 = vector.broadcast %51 : vector<1x1x128xf32> to vector<1x4x128xf32>
    %62 = arith.mulf %61, %60 : vector<1x4x128xf32>
    %63 = arith.addf %57, %62 : vector<1x4x128xf32>
    %64 = vector.extract_strided_slice %6 {offsets = [0, 3, 0], sizes = [1, 1, 128], strides = [1, 1, 1]} : vector<1x4x128xf32> to vector<1x1x128xf32>
    %65 = vector.shape_cast %64 : vector<1x1x128xf32> to vector<1x128xf32>
    %66 = vector.shape_cast %65 : vector<1x128xf32> to vector<1x1x128xf32>
    %67 = vector.extract_strided_slice %7 {offsets = [0, 3, 0], sizes = [1, 1, 128], strides = [1, 1, 1]} : vector<1x4x128xf32> to vector<1x1x128xf32>
    %68 = vector.shape_cast %67 : vector<1x1x128xf32> to vector<1x128xf32>
    %69 = vector.shape_cast %68 : vector<1x128xf32> to vector<1x1x128xf32>
    %c3 = arith.constant 3 : index
    %c0_22 = arith.constant 0 : index
    %c0_23 = arith.constant 0 : index
    %70 = vector.load %arg2[%c3, %c0_22, %c0_23] : memref<4x4x128xf32, #tpu.memory_space<vmem>>, vector<1x4x128xf32>
    %71 = vector.shape_cast %70 : vector<1x4x128xf32> to vector<4x128xf32>
    %72 = vector.shape_cast %71 : vector<4x128xf32> to vector<1x4x128xf32>
    %73 = vector.broadcast %66 : vector<1x1x128xf32> to vector<1x4x128xf32>
    %74 = arith.mulf %73, %72 : vector<1x4x128xf32>
    %75 = arith.addf %63, %74 : vector<1x4x128xf32>
    %c3_24 = arith.constant 3 : index
    %c0_25 = arith.constant 0 : index
    %c0_26 = arith.constant 0 : index
    %76 = vector.load %arg3[%c3_24, %c0_25, %c0_26] : memref<4x4x128xf32, #tpu.memory_space<vmem>>, vector<1x4x128xf32>
    %77 = vector.shape_cast %76 : vector<1x4x128xf32> to vector<4x128xf32>
    %78 = vector.shape_cast %77 : vector<4x128xf32> to vector<1x4x128xf32>
    %79 = vector.broadcast %69 : vector<1x1x128xf32> to vector<1x4x128xf32>
    %80 = arith.mulf %79, %78 : vector<1x4x128xf32>
    %81 = arith.addf %75, %80 : vector<1x4x128xf32>
    %82 = vector.shape_cast %81 : vector<1x4x128xf32> to vector<4x128xf32>
    %83 = arith.truncf %82 : vector<4x128xf32> to vector<4x128xbf16>
    %c0_27 = arith.constant 0 : index
    %c0_28 = arith.constant 0 : index
    %84 = vector.load %arg7[%c0_27, %c0_28] : memref<128x16xbf16, #tpu.memory_space<vmem>>, vector<128x16xbf16>
    %cst_29 = arith.constant dense<0.000000e+00> : vector<4x16xf32>
    %85 = tpu.matmul %83, %84, %cst_29 {dimension_numbers = #tpu.dot_dimension_numbers<[1], [0], [0], [1], [0, 0, 1, 1], [], []>} : vector<4x128xbf16>, vector<128x16xbf16>, vector<4x16xf32> -> vector<4x16xf32>
    %86 = vector.shape_cast %85 : vector<4x16xf32> to vector<1x4x16xf32>
    %c0_30 = arith.constant 0 : index
    %c0_31 = arith.constant 0 : index
    %87 = vector.load %arg4[%c0_30, %c0_31] : memref<4x4xbf16, #tpu.memory_space<vmem>>, vector<4x4xbf16>
    %cst_32 = arith.constant dense<0.000000e+00> : vector<4x16xf32>
    %88 = tpu.matmul %87, %2, %cst_32 {dimension_numbers = #tpu.dot_dimension_numbers<[1], [0], [0], [1], [0, 0, 1, 1], [], []>} : vector<4x4xbf16>, vector<4x16xbf16>, vector<4x16xf32> -> vector<4x16xf32>
    %89 = vector.shape_cast %86 : vector<1x4x16xf32> to vector<4x16xf32>
    %90 = arith.addf %88, %89 : vector<4x16xf32>
    %c0_33 = arith.constant 0 : index
    %c0_34 = arith.constant 0 : index
    %c0_35 = arith.constant 0 : index
    %91 = vector.load %arg8[%c0_33, %c0_34, %c0_35] : memref<1x4x16xf32, #tpu.memory_space<vmem>>, vector<1x4x16xf32>
    %92 = vector.shape_cast %91 : vector<1x4x16xf32> to vector<4x16xf32>
    %93 = vector.shape_cast %90 : vector<4x16xf32> to vector<1x4x16xf32>
    tpu.vector_store %arg8[%c0_33, %c0_34, %c0_35], %93 {strides = array<i32>} : memref<1x4x16xf32, #tpu.memory_space<vmem>>, vector<1x4x16xf32>,
    return
  }
  func.func @transform_0(%arg0: i32) -> (i32, i32, i32) {
    %c0_i32 = arith.constant 0 : i32
    %c0_i32_0 = arith.constant 0 : i32
    %c0_i32_1 = arith.constant 0 : i32
    return %arg0, %c0_i32, %c0_i32_0 : i32, i32, i32
  }
  func.func @transform_1(%arg0: i32) -> (i32, i32, i32) {
    %c0_i32 = arith.constant 0 : i32
    %c0_i32_0 = arith.constant 0 : i32
    %c0_i32_1 = arith.constant 0 : i32
    %c0_i32_2 = arith.constant 0 : i32
    return %c0_i32, %c0_i32_0, %c0_i32_1 : i32, i32, i32
  }
  func.func @transform_2(%arg0: i32) -> (i32, i32, i32) {
    %c0_i32 = arith.constant 0 : i32
    %c0_i32_0 = arith.constant 0 : i32
    %c0_i32_1 = arith.constant 0 : i32
    %c0_i32_2 = arith.constant 0 : i32
    return %c0_i32, %c0_i32_0, %c0_i32_1 : i32, i32, i32
  }
  func.func @transform_3(%arg0: i32) -> (i32, i32) {
    %c0_i32 = arith.constant 0 : i32
    %c0_i32_0 = arith.constant 0 : i32
    %c0_i32_1 = arith.constant 0 : i32
    return %c0_i32, %c0_i32_0 : i32, i32
  }
  func.func @transform_4(%arg0: i32) -> (i32, i32) {
    %c0_i32 = arith.constant 0 : i32
    %c0_i32_0 = arith.constant 0 : i32
    %c0_i32_1 = arith.constant 0 : i32
    return %c0_i32, %c0_i32_0 : i32, i32
  }
  func.func @transform_5(%arg0: i32) -> (i32, i32) {
    %c0_i32 = arith.constant 0 : i32
    %c0_i32_0 = arith.constant 0 : i32
    %c0_i32_1 = arith.constant 0 : i32
    return %c0_i32, %c0_i32_0 : i32, i32
  }
  func.func @transform_6(%arg0: i32) -> (i32, i32) {
    %c0_i32 = arith.constant 0 : i32
    %c0_i32_0 = arith.constant 0 : i32
    %c0_i32_1 = arith.constant 0 : i32
    return %c0_i32, %c0_i32_0 : i32, i32
  }
  func.func @transform_7(%arg0: i32) -> (i32, i32, i32) {
    %c0_i32 = arith.constant 0 : i32
    %c0_i32_0 = arith.constant 0 : i32
    %c0_i32_1 = arith.constant 0 : i32
    return %arg0, %c0_i32, %c0_i32_0 : i32, i32, i32
  }
}

</mosaic_0001>

<bundles_post_ra>
// kernel: neg.1
= control target key start
LH: loop header
LB: loop body
LE: loop exit
PB: predicated region body
PF: predicated region fallthrough
CT: control target
= control target key end

     0   :  { %2 = vsyncpa [#allocation1], 0  ;;  %s75_s6 = smov [#allocation0]   ;;  %s112_s0 = inlined_call_operand.hbm [shape: f32[4,4,6], index: 0, kind: input, shape index: {}]   ;;  %s113_s1 = inlined_call_operand.vmem [shape: f32[4,4,6], index: 1, kind: output, shape index: {}]  }
   0x1   :  { %s6_s7 = sshll.u32 %s75_s6, 4  ;;  %s51_s10 = scalar_lea.hbm %s112_s0, 256  ;;  %s7_s7 = int_to_ptr.vmem [resolvable:$true] %s6_s7 }
   0x2   :  { %p52_p0 = scmp.ne.s32.totalorder %s112_s0, %s51_s10  ;;  %p55_p1 = scmp.lt.u32.totalorder %s51_s10, %s112_s0 }
   0x4   :  { %p57_p2 = pnand %p55_p1, %p52_p0 }
   0x6   :  { %60 = shalt.err (!%p57_p2)
}
   0x7   :  { %s61_s15 = scalar_lea.vmem %s7_s7, 256  ;;  %p66_p4 = scmp.lt.s32.totalorder %s7_s7, %s7_s7 }
   0x8   :  { %p62_p3 = scmp.ne.s32.totalorder %s7_s7, %s61_s15  ;;  %p67_p5 = scmp.lt.s32.totalorder %s61_s15, %s61_s15 }
   0xa   :  { %p68_p6 = por %p67_p5, %p66_p4 }
   0xc   :  { %p69_p7 = pnand %p68_p6, %p62_p3 }
   0xe   :  { %72 = shalt.err (!%p69_p7)
}
   0xf   :  { %s76_s16 = smov 64   ;;  %s77_s17 = smov 4  }
  0x10   :  { %12 = dma.hbm_to_vmem [thread:$0]  %s112_s0, 256, %s7_s7, [#allocation1], %s76_s16, %s76_s16, %s77_s17  }
  0x11   :  { %73 = dma.done.wait [#allocation1], 256  }
  0x12   :  { %74 = vsyncadd [#allocation1], 4294967040  ;;  %v14_v0 = vld [vmem:[#allocation0] sm:$0xf]  ;;  %v21_v1 = vld [vmem:[#allocation0 + $0x4] sm:$0xf] }
  0x13   :  { %v29_v2 = vld [vmem:[#allocation0 + $0x8] sm:$0xf]  ;;  %v17_v3 = vxor.u32 2147483648, %v14_v0  ;;  %v24_v4 = vxor.u32 2147483648, %v21_v1  ;;  %v37_v6 = vld [vmem:[#allocation0 + $0xc] sm:$0xf] }
  0x14   :  { %v32_v5 = vxor.u32 2147483648, %v29_v2  ;;  %v40_v7 = vxor.u32 2147483648, %v37_v6 }
  0x15   :  { %19 = vst [vmem:[%s113_s1] sm:$0xf] %v17_v3  ;;  %45 = vst [vmem:[%s113_s1 + $0x4] sm:$0xf] %v24_v4 }
  0x16   :  { %46 = vst [vmem:[%s113_s1 + $0x8] sm:$0xf] %v32_v5  ;;  %47 = vst [vmem:[%s113_s1 + $0xc] sm:$0xf] %v40_v7 }
  0x17   :  { %44 = vsyncpa [#allocation1], 1 }

// kernel: run.1
= control target key start
LH: loop header
LB: loop body
LE: loop exit
PB: predicated region body
PF: predicated region fallthrough
CT: control target
= control target key end

     0   :  { %12 = vsyncpa [#allocation3], 0  ;;  %s1011_s0 = inlined_call_operand.vmem [shape: f32[2,4,16], index: 0, kind: input, shape index: {}]   ;;  %s1012_s1 = inlined_call_operand.vmem [shape: f32[4,4,128], index: 1, kind: input, shape index: {}]   ;;  %s1013_s2 = inlined_call_operand.vmem [shape: f32[4,4,128], index: 2, kind: input, shape index: {}]   ;;  %s1014_s3 = inlined_call_operand.vmem [shape: bf16[4,4], index: 3, kind: input, shape index: {}]   ;;  %s1015_s4 = inlined_call_operand.vmem [shape: f32[4,128], index: 4, kind: input, shape index: {}]   ;;  %s1016_s5 = inlined_call_operand.vmem [shape: bf16[16,128], index: 5, kind: input, shape index: {}]   ;;  %s1017_s6 = inlined_call_operand.vmem [shape: bf16[128,16], index: 6, kind: input, shape index: {}]   ;;  %s1018_s7 = inlined_call_operand.hbm [shape: f32[2,4,16], index: 7, kind: output, shape index: {}]  }
   0x1   :  { %14 = vsyncpa [#allocation3 + $0x1], 0  ;;  %s854_s24 = smov 0   ;;  %s856_s25 = smov 0  }
   0x2   :  { %s858_s26 = smov 0   ;;  %s860_s27 = smov 0  }
   0x3 LB: > { %s875_s28 = sadd.s32 4294967295, %s808_s27   ;;  %s622_s29 = sadd.s32 4294967294, %s808_s27   ;;  %s808_s27 = sphi %s860_s27, %s1024_s27   ;;  %s804_s26 = sphi %s858_s26, %s1023_s26   ;;  %s800_s25 = sphi %s856_s25, %s1022_s25   ;;  %s796_s24 = sphi %s854_s24, %s1021_s24  }
   0x4   : > { %s879_s30 = sadd.s32 1, %s808_s27   ;;  %s179_s8 = sadd.s32 1, %s804_s26 }
   0x5   : > { %s176_s9 = ssub.s32 %s808_s27, %s879_s30  ;;  %p189_p0 = scmp.ne.s32.totalorder %s804_s26, %s800_s25 }
   0x6   : > { %p177_p1 = scmp.eq.s32.totalorder %s176_s9, 0  ;;  %p190_p2 = scmp.eq.s32.totalorder %s875_s28, 1 }
   0x7   : > { %p195_p3 = scmp.ne.s32.totalorder %s800_s25, %s796_s24  ;;  %p196_p4 = scmp.eq.s32.totalorder %s622_s29, 1 }
   0x8   : > { %s890_s10 = scalar_select %p177_p1, %s804_s26, %s179_s8  }
   0x9   : > { %p892_p5 = por %p190_p2, %p189_p0  ;;  %p896_p6 = por %p196_p4, %p195_p3 }
   0xa   : > { %p625_p7 = scmp.ge.s32.totalorder %s808_s27, 1  ;;  %p239_p8 = scmp.lt.s32.totalorder %s808_s27, 3 }
   0xc   : > { %p240_p9 = pnand %p625_p7, %p239_p8 }
   0xd   : > { %v737_v0 = vld [vmem:[%s1016_s5] sm:$0xff] (!%p240_p9)   ;;  %v810_v1 = vmov (!%p240_p9), 0.0   ;;  %p270_p10 = scmp.lt.s32.totalorder (!%p240_p9), %s875_s28, 1  ;;  %vm811_vm0 = vmmov (!%p240_p9), 0   ;;  %vm285_vm1 = vcmask (!%p240_p9), 130048   ;;  %v739_v5 = vld [vmem:[%s1017_s6 + $0x8] sm:$0xff] (!%p240_p9)   ;;  %v333_v18 = vlaneseq (!%p240_p9) }
   0xe   : > { %243 = sbr.rel (%p240_p9) target bundleno = 603 (0x25b), region = 48  ;;  %662 = vmatprep.subr.bf16.mxu0 (!%p240_p9), %v810_v1  ;;  %668 = vmatprep.subr.bf16.mxu1 (!%p240_p9), %v810_v1  ;;  %v738_v4 = vld [vmem:[%s1017_s6] sm:$0xff] (!%p240_p9)   ;;  %v740_v6 = vld [vmem:[%s1017_s6 + $0x10] sm:$0xff] (!%p240_p9)   ;;  %v741_v7 = vld [vmem:[%s1017_s6 + $0x18] sm:$0xff] (!%p240_p9)   ;;  %vm504_vm2 = vcmask (!%p240_p9), 1041408   ;;  %s812_s20 = smov (!%p240_p9), 64  }
   0xf   : > { %663 = vmatpush3.bf16.msra.mxu0 (!%p240_p9), %v737_v0  ;;  %664 = vmatprep.mubr.msk.bf16.mxu0 (!%p240_p9), %vm811_vm0, %v810_v1  ;;  %v742_v8 = vld [vmem:[%s1017_s6 + $0x20] sm:$0xff] (!%p240_p9)   ;;  %v743_v9 = vld [vmem:[%s1017_s6 + $0x28] sm:$0xff] (!%p240_p9)   ;;  %v744_v10 = vld [vmem:[%s1017_s6 + $0x30] sm:$0xff] (!%p240_p9)   ;;  %vm500_vm3 = vcmask (!%p240_p9), 31744   ;;  %v334_v19 = vshrl.u32 (!%p240_p9), %v333_v18, 7  ;;  %s646_s17 = sshll.u32 (!%p240_p9), %s875_s28, 6 }
  0x10   : > { %688 = vmatprep.subr.bf16.mxu0 (!%p240_p9), %v810_v1  ;;  %684 = vmatprep.mubr.msk.bf16.mxu1 (!%p240_p9), %vm811_vm0, %v810_v1  ;;  %v745_v15 = vld [vmem:[%s1017_s6 + $0x38] sm:$0xff] (!%p240_p9)   ;;  %v499_v17 = vld [vmem:[%s1014_s3] sm:$0x3] (!%p240_p9)  ;;  %v630_v31 = vld [vmem:[%s1012_s1 + $0x4] sm:$0xf] (!%p240_p9)  ;;  %vm547_vm4 = vcmask (!%p240_p9), 125952   ;;  %s969_s22 = scalar_lea.hbm (!%p240_p9), %s1018_s7, %s646_s17 }
  0x11   : > { %669 = vmatpush3.bf16.msra.mxu1 (!%p240_p9), %v738_v4  ;;  %v335_v20 = vsub.s32 (!%p240_p9), 0, %v334_v19  ;;  %v332_v22 = vld [vmem:[%s1012_s1] sm:$0xf] (!%p240_p9)  ;;  %v350_v23 = vsub.s32 (!%p240_p9), 1, %v334_v19  ;;  %v366_v30 = vsub.s32 (!%p240_p9), 2, %v334_v19  ;;  %v382_v39 = vsub.s32 (!%p240_p9), 3, %v334_v19 }
  0x12   : > { %670 = vmatprep.subr.bf16.mxu1 (!%p240_p9), %v810_v1  ;;  %v331_v26 = vld [vmem:[%s1015_s4] sm:$0xf] (!%p240_p9)  ;;  %v631_v35 = vld [vmem:[%s1013_s2 + $0x4] sm:$0xf] (!%p240_p9)  ;;  %v632_v40 = vld [vmem:[%s1012_s1 + $0x8] sm:$0xf] (!%p240_p9) }
  0x13   : > { %v339_v27 = vld [vmem:[%s1013_s2] sm:$0xf] (!%p240_p9)  ;;  %v633_v44 = vld [vmem:[%s1013_s2 + $0x8] sm:$0xf] (!%p240_p9)  ;;  %v634_v48 = vld [vmem:[%s1012_s1 + $0xc] sm:$0xf] (!%p240_p9) }
  0x14   : > { %v635_v52 = vld [vmem:[%s1013_s2 + $0xc] sm:$0xf] (!%p240_p9)  ;;  %s813_s29 = smov (!%p240_p9), [#allocation2]  }
  0x15   : > { %s271_s15 = scalar_select %p270_p10, %s875_s28, 1  ;;  %671 = vmatpush3.bf16.msra.mxu1 %v739_v5 }
  0x16   : > { %672 = vmatprep.subr.bf16.mxu1 %v810_v1  ;;  %s750_s8 = sshll.u32 %s813_s29, 4  ;;  %s751_s8 = int_to_ptr.vmem [resolvable:$false] %s750_s8 }
  0x17   : > { %s627_s16 = sshll.u32 %s271_s15, 2  ;;  %s267_s15 = sand.u32 1, %s800_s25  }
  0x18   : > { %s273_s19 = scalar_lea.vmem %s1011_s0, %s627_s16  ;;  %s626_s16 = sshll.u32 %s267_s15, 2 }
  0x19   : > { %v275_v2 = vld [vmem:[%s273_s19] sm:$0xf]  ;;  %673 = vmatpush3.bf16.msra.mxu1 %v740_v6  ;;  %s269_s18 = scalar_lea.vmem [#allocation2], %s626_s16  ;;  %s550_s28 = scalar_lea.sflag [#allocation3], %s267_s15 }
  0x1a   : > { %v276_v3 = vpack.c.bf16 %v275_v2, %v275_v2  ;;  %674 = vmatprep.subr.bf16.mxu1 %v810_v1  ;;  %s563_s19 = sshll.u32 %s269_s18, 4  ;;  %s752_s9 = scalar_lea.vmem %s751_s8, 128  ;;  %s971_s19 = int_to_ptr.vmem [resolvable:$true] %s563_s19 }
  0x1b   : > { %s746_s23 = scalar_lea.vmem %s971_s19, 64  ;;  %p753_p0 = scmp.lt.s32.totalorder %s971_s19, %s751_s8 }
  0x1c   : > { %665 = vmatmul.mubr.msk.bf16.vlgmr.msra.gmra.mrb[0].mxu0 %vm285_vm1, %v276_v3  ;;  %v505_v14 = vsel %vm504_vm2, %v276_v3, 0  ;;  %p747_p11 = scmp.ne.s32.totalorder %s971_s19, %s746_s23  ;;  %p754_p1 = scmp.lt.s32.totalorder %s752_s9, %s746_s23 }
  0x1d   : > { %690 = vmatprep.mubr.msk.bf16.mxu0 %vm811_vm0, %v810_v1  ;;  %675 = vmatpush3.bf16.msra.mxu1 %v741_v7 }
  0x1e   : > { %676 = vmatprep.subr.bf16.mxu1 %v810_v1  ;;  %689 = vmatpush3.bf16.msra.mxu0 %v505_v14  ;;  %p748_p12 = pnand %p747_p11, %p892_p5  ;;  %p755_p2 = por %p754_p1, %p753_p0 }
  0x20   : > { %p749_p13 = pneg %p748_p12 }
  0x21   : > { %677 = vmatpush3.bf16.msra.mxu1 %v742_v8 }
  0x22   : > { %678 = vmatprep.subr.bf16.mxu1 %v810_v1  ;;  %p756_p3 = pnand %p755_p2, %p749_p13 }
  0x24   : > { %691 = vmatmul.mubr.msk.bf16.vlgmr.msra.gmra.mrb[4].mxu0 %vm500_vm3, %v499_v17 }
  0x25   : > { %679 = vmatpush3.bf16.msra.mxu1 %v743_v9 }
  0x26   : > { %680 = vmatprep.subr.bf16.mxu1 %v810_v1 }
  0x29   : > { %681 = vmatpush3.bf16.msra.mxu1 %v744_v10 }
  0x2a   : > { %682 = vmatprep.subr.bf16.mxu1 %v810_v1 }
  0x2d   : > { %683 = vmatpush3.bf16.msra.mxu1 %v745_v15 }
  0xef   : > { %v323_v11 = vpop.f32.mrb[0].mxu0 }
  0xf0   : > { %v666_v12 = vpop.f32.mrb[1].mxu0  ;;  %329 = vrot.lane.b32.xlu0 %v323_v11, %s812_s20  ;;  %v336_v21 = vrot.slane %v323_v11, %v335_v20  ;;  %v351_v29 = vrot.slane %v323_v11, %v350_v23  ;;  %v367_v38 = vrot.slane %v323_v11, %v366_v30  ;;  %v383_v47 = vrot.slane %v323_v11, %v382_v39 }
  0xf1   : > { %v326_v13 = vpop.f32.mrb[2].mxu0 }
  0xf2   : > { %v667_v16 = vpop.f32.mrb[3].mxu0  ;;  %v337_v24 = vmul.f32 %v336_v21, %v332_v22  ;;  %v352_v37 = vmul.f32 %v630_v31, %v351_v29  ;;  %v368_v46 = vmul.f32 %v632_v40, %v367_v38  ;;  %v384_v54 = vmul.f32 %v634_v48, %v383_v47 }
  0xf4   : > { %v338_v32 = vadd.f32 %v337_v24, %v331_v26 }
  0xf7   : > { %v541_v59 = vpop.f32.mrb[4].mxu0 }
  0xf8   : > { %v692_v60 = vpop.f32.mrb[5].mxu0 }
  0xf9   : > { %v544_v61 = vpop.f32.mrb[6].mxu0 }
  0xfa   : > { %v693_v62 = vpop.f32.mrb[7].mxu0 }
 0x162   : > { %v330_v25 = vpop.permute.xlu0 %329 }
 0x163   : > { %v343_v28 = vrot.slane %v330_v25, %v335_v20  ;;  %v359_v34 = vrot.slane %v330_v25, %v350_v23  ;;  %v375_v43 = vrot.slane %v330_v25, %v366_v30  ;;  %v391_v51 = vrot.slane %v330_v25, %v382_v39 }
 0x165   : > { %v344_v33 = vmul.f32 %v343_v28, %v339_v27  ;;  %v360_v42 = vmul.f32 %v631_v35, %v359_v34  ;;  %v376_v50 = vmul.f32 %v633_v44, %v375_v43  ;;  %v392_v55 = vmul.f32 %v635_v52, %v391_v51 }
 0x167   : > { %v345_v36 = vadd.f32 %v344_v33, %v338_v32 }
 0x169   : > { %v353_v41 = vadd.f32 %v352_v37, %v345_v36 }
 0x16b   : > { %v361_v45 = vadd.f32 %v360_v42, %v353_v41 }
 0x16d   : > { %v369_v49 = vadd.f32 %v368_v46, %v361_v45 }
 0x16f   : > { %v377_v53 = vadd.f32 %v376_v50, %v369_v49 }
 0x171   : > { %v385_v56 = vadd.f32 %v384_v54, %v377_v53 }
 0x173   : > { %v393_v57 = vadd.f32 %v392_v55, %v385_v56 }
 0x175   : > { %v394_v58 = vpack.c.bf16 %v393_v57, %v393_v57 }
 0x177   : > { %685 = vmatmul.mubr.bf16.vlgmr.msra.gmra.mrb[0].mxu1 %v394_v58 }
 0x24a   : > { %v493_v63 = vpop.f32.mrb[0].mxu1 }
 0x24b   : > { %v542_v0 = vadd.f32 %v541_v59, %v493_v63  ;;  %v686_v1 = vpop.f32.mrb[1].mxu1 }
 0x24c   : > { %v496_v2 = vpop.f32.mrb[2].mxu1 }
 0x24d   : > { %v687_v3 = vpop.f32.mrb[3].mxu1  ;;  %548 = vst.msk [vmem:[%s269_s18] sm:$0xf] %vm547_vm4, %v542_v0 }
 0x24e   : > { %759 = shalt.err (!%p756_p3)
}
 0x24f   : > { %s760_s13 = scalar_lea.hbm %s969_s22, 64  ;;  %s764_s16 = scalar_lea.hbm %s1018_s7, 128 }
 0x250   : > { %p761_p4 = scmp.ne.s32.totalorder %s969_s22, %s760_s13  ;;  %p765_p9 = scmp.lt.u32.totalorder %s969_s22, %s1018_s7 }
 0x251   : > { %p766_p10 = scmp.lt.u32.totalorder %s764_s16, %s760_s13  ;;  %p768_p12 = scmp.lt.u32.totalorder %s760_s13, %s969_s22 }
 0x252   : > { %p762_p7 = pnand %p761_p4, %p892_p5 }
 0x253   : > { %p767_p11 = por %p766_p10, %p765_p9 }
 0x254   : > { %p763_p8 = pneg %p762_p7 }
 0x255   : > { %p769_p13 = por %p768_p12, %p767_p11 }
 0x257   : > { %p770_p0 = pnand %p769_p13, %p763_p8 }
 0x259   : > { %773 = shalt.err (!%p770_p0)
}
 0x25a   : > { %695 = dma.vmem_to_hbm [thread:$0]  (%p892_p5), %s971_s19, 64, %s969_s22, %s550_s28  }
 0x25b PF: > { %p701_p1 = scmp.ge.s32.totalorder %s808_s27, 2  ;;  %s575_s20 = sand.u32 1, %s796_s24  }
 0x25c   : > { %s576_s21 = scalar_lea.sflag [#allocation3], %s575_s20 }
 0x25d   : > { %p698_p2 = pnand %p701_p1, %p896_p6 }
 0x25f   : > { %791 = dma.done.wait (!%p698_p2), %s576_s21, 64  }
 0x260   : > { %793 = vsyncadd (!%p698_p2), %s576_s21, 4294967232  ;;  %p17_p3 = scmp.ge.s32.totalorder %s879_s30, 4   ;;  %s1021_s24 = smov %s800_s25 }
 0x261   : > { %s1022_s25 = smov %s804_s26  ;;  %s1023_s26 = smov %s890_s10 }
 0x262   : > { %s1024_s27 = smov %s879_s30  ;;  %19 = sbr.rel (!%p17_p3) target bundleno = 3 (0x3), region = 89 }
 0x269   :  { %581 = vsyncpa [#allocation3], 1 }
 0x26a   :  { %583 = vsyncpa [#allocation3 + $0x1], 1 }

// kernel: neg.1
= control target key start
LH: loop header
LB: loop body
LE: loop exit
PB: predicated region body
PF: predicated region fallthrough
CT: control target
= control target key end

     0   :  { %2 = vsyncpa [#allocation1], 0  ;;  %s75_s6 = smov [#allocation0]   ;;  %s112_s0 = inlined_call_operand.hbm [shape: f32[4,4,6], index: 0, kind: input, shape index: {}]   ;;  %s113_s1 = inlined_call_operand.vmem [shape: f32[4,4,6], index: 1, kind: output, shape index: {}]  }
   0x1   :  { %s6_s7 = sshll.u32 %s75_s6, 4  ;;  %s51_s10 = scalar_lea.hbm %s112_s0, 256  ;;  %s7_s7 = int_to_ptr.vmem [resolvable:$true] %s6_s7 }
   0x2   :  { %p52_p0 = scmp.ne.s32.totalorder %s112_s0, %s51_s10  ;;  %p55_p1 = scmp.lt.u32.totalorder %s51_s10, %s112_s0 }
   0x4   :  { %p57_p2 = pnand %p55_p1, %p52_p0 }
   0x6   :  { %60 = shalt.err (!%p57_p2)
}
   0x7   :  { %s61_s15 = scalar_lea.vmem %s7_s7, 256  ;;  %p66_p4 = scmp.lt.s32.totalorder %s7_s7, %s7_s7 }
   0x8   :  { %p62_p3 = scmp.ne.s32.totalorder %s7_s7, %s61_s15  ;;  %p67_p5 = scmp.lt.s32.totalorder %s61_s15, %s61_s15 }
   0xa   :  { %p68_p6 = por %p67_p5, %p66_p4 }
   0xc   :  { %p69_p7 = pnand %p68_p6, %p62_p3 }
   0xe   :  { %72 = shalt.err (!%p69_p7)
}
   0xf   :  { %s76_s16 = smov 64   ;;  %s77_s17 = smov 4  }
  0x10   :  { %12 = dma.hbm_to_vmem [thread:$0]  %s112_s0, 256, %s7_s7, [#allocation1], %s76_s16, %s76_s16, %s77_s17  }
  0x11   :  { %73 = dma.done.wait [#allocation1], 256  }
  0x12   :  { %74 = vsyncadd [#allocation1], 4294967040  ;;  %v14_v0 = vld [vmem:[#allocation0] sm:$0xf]  ;;  %v21_v1 = vld [vmem:[#allocation0 + $0x4] sm:$0xf] }
  0x13   :  { %v29_v2 = vld [vmem:[#allocation0 + $0x8] sm:$0xf]  ;;  %v17_v3 = vxor.u32 2147483648, %v14_v0  ;;  %v24_v4 = vxor.u32 2147483648, %v21_v1  ;;  %v37_v6 = vld [vmem:[#allocation0 + $0xc] sm:$0xf] }
  0x14   :  { %v32_v5 = vxor.u32 2147483648, %v29_v2  ;;  %v40_v7 = vxor.u32 2147483648, %v37_v6 }
  0x15   :  { %19 = vst [vmem:[%s113_s1] sm:$0xf] %v17_v3  ;;  %45 = vst [vmem:[%s113_s1 + $0x4] sm:$0xf] %v24_v4 }
  0x16   :  { %46 = vst [vmem:[%s113_s1 + $0x8] sm:$0xf] %v32_v5  ;;  %47 = vst [vmem:[%s113_s1 + $0xc] sm:$0xf] %v40_v7 }
  0x17   :  { %44 = vsyncpa [#allocation1], 1 }

// kernel: run.1
= control target key start
LH: loop header
LB: loop body
LE: loop exit
PB: predicated region body
PF: predicated region fallthrough
CT: control target
= control target key end

     0   :  { %12 = vsyncpa [#allocation3], 0  ;;  %s1011_s0 = inlined_call_operand.vmem [shape: f32[2,4,16], index: 0, kind: input, shape index: {}]   ;;  %s1012_s1 = inlined_call_operand.vmem [shape: f32[4,4,128], index: 1, kind: input, shape index: {}]   ;;  %s1013_s2 = inlined_call_operand.vmem [shape: f32[4,4,128], index: 2, kind: input, shape index: {}]   ;;  %s1014_s3 = inlined_call_operand.vmem [shape: bf16[4,4], index: 3, kind: input, shape index: {}]   ;;  %s1015_s4 = inlined_call_operand.vmem [shape: f32[4,128], index: 4, kind: input, shape index: {}]   ;;  %s1016_s5 = inlined_call_operand.vmem [shape: bf16[16,128], index: 5, kind: input, shape index: {}]   ;;  %s1017_s6 = inlined_call_operand.vmem [shape: bf16[128,16], index: 6, kind: input, shape index: {}]   ;;  %s1018_s7 = inlined_call_operand.hbm [shape: f32[2,4,16], index: 7, kind: output, shape index: {}]  }
   0x1   :  { %14 = vsyncpa [#allocation3 + $0x1], 0  ;;  %s854_s24 = smov 0   ;;  %s856_s25 = smov 0  }
   0x2   :  { %s858_s26 = smov 0   ;;  %s860_s27 = smov 0  }
   0x3 LB: > { %s875_s28 = sadd.s32 4294967295, %s808_s27   ;;  %s622_s29 = sadd.s32 4294967294, %s808_s27   ;;  %s808_s27 = sphi %s860_s27, %s1024_s27   ;;  %s804_s26 = sphi %s858_s26, %s1023_s26   ;;  %s800_s25 = sphi %s856_s25, %s1022_s25   ;;  %s796_s24 = sphi %s854_s24, %s1021_s24  }
   0x4   : > { %s879_s30 = sadd.s32 1, %s808_s27   ;;  %s179_s8 = sadd.s32 1, %s804_s26 }
   0x5   : > { %s176_s9 = ssub.s32 %s808_s27, %s879_s30  ;;  %p189_p0 = scmp.ne.s32.totalorder %s804_s26, %s800_s25 }
   0x6   : > { %p177_p1 = scmp.eq.s32.totalorder %s176_s9, 0  ;;  %p190_p2 = scmp.eq.s32.totalorder %s875_s28, 1 }
   0x7   : > { %p195_p3 = scmp.ne.s32.totalorder %s800_s25, %s796_s24  ;;  %p196_p4 = scmp.eq.s32.totalorder %s622_s29, 1 }
   0x8   : > { %s890_s10 = scalar_select %p177_p1, %s804_s26, %s179_s8  }
   0x9   : > { %p892_p5 = por %p190_p2, %p189_p0  ;;  %p896_p6 = por %p196_p4, %p195_p3 }
   0xa   : > { %p625_p7 = scmp.ge.s32.totalorder %s808_s27, 1  ;;  %p239_p8 = scmp.lt.s32.totalorder %s808_s27, 3 }
   0xc   : > { %p240_p9 = pnand %p625_p7, %p239_p8 }
   0xd   : > { %v737_v0 = vld [vmem:[%s1016_s5] sm:$0xff] (!%p240_p9)   ;;  %v810_v1 = vmov (!%p240_p9), 0.0   ;;  %p270_p10 = scmp.lt.s32.totalorder (!%p240_p9), %s875_s28, 1  ;;  %vm811_vm0 = vmmov (!%p240_p9), 0   ;;  %vm285_vm1 = vcmask (!%p240_p9), 130048   ;;  %v739_v5 = vld [vmem:[%s1017_s6 + $0x8] sm:$0xff] (!%p240_p9)   ;;  %v333_v18 = vlaneseq (!%p240_p9) }
   0xe   : > { %243 = sbr.rel (%p240_p9) target bundleno = 603 (0x25b), region = 48  ;;  %662 = vmatprep.subr.bf16.mxu0 (!%p240_p9), %v810_v1  ;;  %668 = vmatprep.subr.bf16.mxu1 (!%p240_p9), %v810_v1  ;;  %v738_v4 = vld [vmem:[%s1017_s6] sm:$0xff] (!%p240_p9)   ;;  %v740_v6 = vld [vmem:[%s1017_s6 + $0x10] sm:$0xff] (!%p240_p9)   ;;  %v741_v7 = vld [vmem:[%s1017_s6 + $0x18] sm:$0xff] (!%p240_p9)   ;;  %vm504_vm2 = vcmask (!%p240_p9), 1041408   ;;  %s812_s20 = smov (!%p240_p9), 64  }
   0xf   : > { %663 = vmatpush3.bf16.msra.mxu0 (!%p240_p9), %v737_v0  ;;  %664 = vmatprep.mubr.msk.bf16.mxu0 (!%p240_p9), %vm811_vm0, %v810_v1  ;;  %v742_v8 = vld [vmem:[%s1017_s6 + $0x20] sm:$0xff] (!%p240_p9)   ;;  %v743_v9 = vld [vmem:[%s1017_s6 + $0x28] sm:$0xff] (!%p240_p9)   ;;  %v744_v10 = vld [vmem:[%s1017_s6 + $0x30] sm:$0xff] (!%p240_p9)   ;;  %vm500_vm3 = vcmask (!%p240_p9), 31744   ;;  %v334_v19 = vshrl.u32 (!%p240_p9), %v333_v18, 7  ;;  %s646_s17 = sshll.u32 (!%p240_p9), %s875_s28, 6 }
  0x10   : > { %688 = vmatprep.subr.bf16.mxu0 (!%p240_p9), %v810_v1  ;;  %684 = vmatprep.mubr.msk.bf16.mxu1 (!%p240_p9), %vm811_vm0, %v810_v1  ;;  %v745_v15 = vld [vmem:[%s1017_s6 + $0x38] sm:$0xff] (!%p240_p9)   ;;  %v499_v17 = vld [vmem:[%s1014_s3] sm:$0x3] (!%p240_p9)  ;;  %v630_v31 = vld [vmem:[%s1012_s1 + $0x4] sm:$0xf] (!%p240_p9)  ;;  %vm547_vm4 = vcmask (!%p240_p9), 125952   ;;  %s969_s22 = scalar_lea.hbm (!%p240_p9), %s1018_s7, %s646_s17 }
  0x11   : > { %669 = vmatpush3.bf16.msra.mxu1 (!%p240_p9), %v738_v4  ;;  %v335_v20 = vsub.s32 (!%p240_p9), 0, %v334_v19  ;;  %v332_v22 = vld [vmem:[%s1012_s1] sm:$0xf] (!%p240_p9)  ;;  %v350_v23 = vsub.s32 (!%p240_p9), 1, %v334_v19  ;;  %v366_v30 = vsub.s32 (!%p240_p9), 2, %v334_v19  ;;  %v382_v39 = vsub.s32 (!%p240_p9), 3, %v334_v19 }
  0x12   : > { %670 = vmatprep.subr.bf16.mxu1 (!%p240_p9), %v810_v1  ;;  %v331_v26 = vld [vmem:[%s1015_s4] sm:$0xf] (!%p240_p9)  ;;  %v631_v35 = vld [vmem:[%s1013_s2 + $0x4] sm:$0xf] (!%p240_p9)  ;;  %v632_v40 = vld [vmem:[%s1012_s1 + $0x8] sm:$0xf] (!%p240_p9) }
  0x13   : > { %v339_v27 = vld [vmem:[%s1013_s2] sm:$0xf] (!%p240_p9)  ;;  %v633_v44 = vld [vmem:[%s1013_s2 + $0x8] sm:$0xf] (!%p240_p9)  ;;  %v634_v48 = vld [vmem:[%s1012_s1 + $0xc] sm:$0xf] (!%p240_p9) }
  0x14   : > { %v635_v52 = vld [vmem:[%s1013_s2 + $0xc] sm:$0xf] (!%p240_p9)  ;;  %s813_s29 = smov (!%p240_p9), [#allocation2]  }
  0x15   : > { %s271_s15 = scalar_select %p270_p10, %s875_s28, 1  ;;  %671 = vmatpush3.bf16.msra.mxu1 %v739_v5 }
  0x16   : > { %672 = vmatprep.subr.bf16.mxu1 %v810_v1  ;;  %s750_s8 = sshll.u32 %s813_s29, 4  ;;  %s751_s8 = int_to_ptr.vmem [resolvable:$false] %s750_s8 }
  0x17   : > { %s627_s16 = sshll.u32 %s271_s15, 2  ;;  %s267_s15 = sand.u32 1, %s800_s25  }
  0x18   : > { %s273_s19 = scalar_lea.vmem %s1011_s0, %s627_s16  ;;  %s626_s16 = sshll.u32 %s267_s15, 2 }
  0x19   : > { %v275_v2 = vld [vmem:[%s273_s19] sm:$0xf]  ;;  %673 = vmatpush3.bf16.msra.mxu1 %v740_v6  ;;  %s269_s18 = scalar_lea.vmem [#allocation2], %s626_s16  ;;  %s550_s28 = scalar_lea.sflag [#allocation3], %s267_s15 }
  0x1a   : > { %v276_v3 = vpack.c.bf16 %v275_v2, %v275_v2  ;;  %674 = vmatprep.subr.bf16.mxu1 %v810_v1  ;;  %s563_s19 = sshll.u32 %s269_s18, 4  ;;  %s752_s9 = scalar_lea.vmem %s751_s8, 128  ;;  %s971_s19 = int_to_ptr.vmem [resolvable:$true] %s563_s19 }
  0x1b   : > { %s746_s23 = scalar_lea.vmem %s971_s19, 64  ;;  %p753_p0 = scmp.lt.s32.totalorder %s971_s19, %s751_s8 }
  0x1c   : > { %665 = vmatmul.mubr.msk.bf16.vlgmr.msra.gmra.mrb[0].mxu0 %vm285_vm1, %v276_v3  ;;  %v505_v14 = vsel %vm504_vm2, %v276_v3, 0  ;;  %p747_p11 = scmp.ne.s32.totalorder %s971_s19, %s746_s23  ;;  %p754_p1 = scmp.lt.s32.totalorder %s752_s9, %s746_s23 }
  0x1d   : > { %690 = vmatprep.mubr.msk.bf16.mxu0 %vm811_vm0, %v810_v1  ;;  %675 = vmatpush3.bf16.msra.mxu1 %v741_v7 }
  0x1e   : > { %676 = vmatprep.subr.bf16.mxu1 %v810_v1  ;;  %689 = vmatpush3.bf16.msra.mxu0 %v505_v14  ;;  %p748_p12 = pnand %p747_p11, %p892_p5  ;;  %p755_p2 = por %p754_p1, %p753_p0 }
  0x20   : > { %p749_p13 = pneg %p748_p12 }
  0x21   : > { %677 = vmatpush3.bf16.msra.mxu1 %v742_v8 }
  0x22   : > { %678 = vmatprep.subr.bf16.mxu1 %v810_v1  ;;  %p756_p3 = pnand %p755_p2, %p749_p13 }
  0x24   : > { %691 = vmatmul.mubr.msk.bf16.vlgmr.msra.gmra.mrb[4].mxu0 %vm500_vm3, %v499_v17 }
  0x25   : > { %679 = vmatpush3.bf16.msra.mxu1 %v743_v9 }
  0x26   : > { %680 = vmatprep.subr.bf16.mxu1 %v810_v1 }
  0x29   : > { %681 = vmatpush3.bf16.msra.mxu1 %v744_v10 }
  0x2a   : > { %682 = vmatprep.subr.bf16.mxu1 %v810_v1 }
  0x2d   : > { %683 = vmatpush3.bf16.msra.mxu1 %v745_v15 }
  0xef   : > { %v323_v11 = vpop.f32.mrb[0].mxu0 }
  0xf0   : > { %v666_v12 = vpop.f32.mrb[1].mxu0  ;;  %329 = vrot.lane.b32.xlu0 %v323_v11, %s812_s20  ;;  %v336_v21 = vrot.slane %v323_v11, %v335_v20  ;;  %v351_v29 = vrot.slane %v323_v11, %v350_v23  ;;  %v367_v38 = vrot.slane %v323_v11, %v366_v30  ;;  %v383_v47 = vrot.slane %v323_v11, %v382_v39 }
  0xf1   : > { %v326_v13 = vpop.f32.mrb[2].mxu0 }
  0xf2   : > { %v667_v16 = vpop.f32.mrb[3].mxu0  ;;  %v337_v24 = vmul.f32 %v336_v21, %v332_v22  ;;  %v352_v37 = vmul.f32 %v630_v31, %v351_v29  ;;  %v368_v46 = vmul.f32 %v632_v40, %v367_v38  ;;  %v384_v54 = vmul.f32 %v634_v48, %v383_v47 }
  0xf4   : > { %v338_v32 = vadd.f32 %v337_v24, %v331_v26 }
  0xf7   : > { %v541_v59 = vpop.f32.mrb[4].mxu0 }
  0xf8   : > { %v692_v60 = vpop.f32.mrb[5].mxu0 }
  0xf9   : > { %v544_v61 = vpop.f32.mrb[6].mxu0 }
  0xfa   : > { %v693_v62 = vpop.f32.mrb[7].mxu0 }
 0x162   : > { %v330_v25 = vpop.permute.xlu0 %329 }
 0x163   : > { %v343_v28 = vrot.slane %v330_v25, %v335_v20  ;;  %v359_v34 = vrot.slane %v330_v25, %v350_v23  ;;  %v375_v43 = vrot.slane %v330_v25, %v366_v30  ;;  %v391_v51 = vrot.slane %v330_v25, %v382_v39 }
 0x165   : > { %v344_v33 = vmul.f32 %v343_v28, %v339_v27  ;;  %v360_v42 = vmul.f32 %v631_v35, %v359_v34  ;;  %v376_v50 = vmul.f32 %v633_v44, %v375_v43  ;;  %v392_v55 = vmul.f32 %v635_v52, %v391_v51 }
 0x167   : > { %v345_v36 = vadd.f32 %v344_v33, %v338_v32 }
 0x169   : > { %v353_v41 = vadd.f32 %v352_v37, %v345_v36 }
 0x16b   : > { %v361_v45 = vadd.f32 %v360_v42, %v353_v41 }
 0x16d   : > { %v369_v49 = vadd.f32 %v368_v46, %v361_v45 }
 0x16f   : > { %v377_v53 = vadd.f32 %v376_v50, %v369_v49 }
 0x171   : > { %v385_v56 = vadd.f32 %v384_v54, %v377_v53 }
 0x173   : > { %v393_v57 = vadd.f32 %v392_v55, %v385_v56 }
 0x175   : > { %v394_v58 = vpack.c.bf16 %v393_v57, %v393_v57 }
 0x177   : > { %685 = vmatmul.mubr.bf16.vlgmr.msra.gmra.mrb[0].mxu1 %v394_v58 }
 0x24a   : > { %v493_v63 = vpop.f32.mrb[0].mxu1 }
 0x24b   : > { %v542_v0 = vadd.f32 %v541_v59, %v493_v63  ;;  %v686_v1 = vpop.f32.mrb[1].mxu1 }
 0x24c   : > { %v496_v2 = vpop.f32.mrb[2].mxu1 }
 0x24d   : > { %v687_v3 = vpop.f32.mrb[3].mxu1  ;;  %548 = vst.msk [vmem:[%s269_s18] sm:$0xf] %vm547_vm4, %v542_v0 }
 0x24e   : > { %759 = shalt.err (!%p756_p3)
}
 0x24f   : > { %s760_s13 = scalar_lea.hbm %s969_s22, 64  ;;  %s764_s16 = scalar_lea.hbm %s1018_s7, 128 }
 0x250   : > { %p761_p4 = scmp.ne.s32.totalorder %s969_s22, %s760_s13  ;;  %p765_p9 = scmp.lt.u32.totalorder %s969_s22, %s1018_s7 }
 0x251   : > { %p766_p10 = scmp.lt.u32.totalorder %s764_s16, %s760_s13  ;;  %p768_p12 = scmp.lt.u32.totalorder %s760_s13, %s969_s22 }
 0x252   : > { %p762_p7 = pnand %p761_p4, %p892_p5 }
 0x253   : > { %p767_p11 = por %p766_p10, %p765_p9 }
 0x254   : > { %p763_p8 = pneg %p762_p7 }
 0x255   : > { %p769_p13 = por %p768_p12, %p767_p11 }
 0x257   : > { %p770_p0 = pnand %p769_p13, %p763_p8 }
 0x259   : > { %773 = shalt.err (!%p770_p0)
}
 0x25a   : > { %695 = dma.vmem_to_hbm [thread:$0]  (%p892_p5), %s971_s19, 64, %s969_s22, %s550_s28  }
 0x25b PF: > { %p701_p1 = scmp.ge.s32.totalorder %s808_s27, 2  ;;  %s575_s20 = sand.u32 1, %s796_s24  }
 0x25c   : > { %s576_s21 = scalar_lea.sflag [#allocation3], %s575_s20 }
 0x25d   : > { %p698_p2 = pnand %p701_p1, %p896_p6 }
 0x25f   : > { %791 = dma.done.wait (!%p698_p2), %s576_s21, 64  }
 0x260   : > { %793 = vsyncadd (!%p698_p2), %s576_s21, 4294967232  ;;  %p17_p3 = scmp.ge.s32.totalorder %s879_s30, 4   ;;  %s1021_s24 = smov %s800_s25 }
 0x261   : > { %s1022_s25 = smov %s804_s26  ;;  %s1023_s26 = smov %s890_s10 }
 0x262   : > { %s1024_s27 = smov %s879_s30  ;;  %19 = sbr.rel (!%p17_p3) target bundleno = 3 (0x3), region = 89 }
 0x269   :  { %581 = vsyncpa [#allocation3], 1 }
 0x26a   :  { %583 = vsyncpa [#allocation3 + $0x1], 1 }

</bundles_post_ra>
